<compile_context>
chip_gen: v6e
topology: v6e:2x2x1
jax: 0.10.0
libtpu: 0.0.40
codegen_flags: <defaults>
</compile_context>

<pallas_src>
import functools

import jax
import jax.numpy as jnp
from jax.experimental import pallas as pl
from jax.experimental.pallas import tpu as pltpu

KSIZE = 3  # conv kernel size (padding = 1 -> "same" length)


def _shift_with_halo(a, not_first, not_last):
    """Return (x[l-1], x[l+1]) with zero 'same'-padding at every per-sample boundary.

    a: (c, m) where m = batch_block * L and samples are contiguous along lanes.
    """
    c, m = a.shape
    z = jnp.zeros((c, 1), a.dtype)
    a_prev = jnp.concatenate([z, a[:, : m - 1]], axis=1)   # x[l-1]
    a_next = jnp.concatenate([a[:, 1:], z], axis=1)        # x[l+1]
    a_prev = jnp.where(not_first, a_prev, 0.0)              # zero at each sample start
    a_next = jnp.where(not_last, a_next, 0.0)               # zero at each sample end
    return a_prev, a_next


def _fused_denoise_kernel(x_ref, w0_ref, b0_ref, w_ref, b_ref, o_ref, *,
                          length, n_rest, compute_dtype):
    """All Conv1d(k=3, pad=1)+ReLU layers for one batch block, fully batched.

    x_ref : (C_in0, BN*L)            raw input channels (not padded)
    w0_ref: (C, KSIZE*C_in0)         layer-0 im2col weights (tap-major columns)
    b0_ref: (C, 1)
    w_ref : (max(n_rest,1), C, 3*C)  layers 1.. im2col weights (tap-major columns)
    b_ref : (max(n_rest,1), C, 1)
    o_ref : (C, BN*L)
    """
    c_in0, m = x_ref.shape
    c = o_ref.shape[0]

    # Per-sample boundary masks, hoisted once (lane position within each sample).
    pos = jax.lax.broadcasted_iota(jnp.int32, (c, m), 1) % length
    not_first = pos > 0
    not_last = pos < (length - 1)

    # ---- layer 0: in_channel -> C (input channels are NOT zero-padded in HBM) ----
    pos0 = jax.lax.broadcasted_iota(jnp.int32, (c_in0, m), 1) % length
    nf0 = pos0 > 0
    nl0 = pos0 < (length - 1)

    x0 = x_ref[...].astype(jnp.float32)                     # (c_in0, m)
    xp0, xn0 = _shift_with_halo(x0, nf0, nl0)
    b0 = b0_ref[...]                                         # (c, 1) f32

    if c_in0 == 1:
        # 3-tap VPU broadcast-multiply: w0 is (C, 3), taps are (1, m).
        w0 = w0_ref[...].astype(jnp.float32)
        acc = w0[:, 0:1] * xp0 + w0[:, 1:2] * x0 + w0[:, 2:3] * xn0
    else:
        cat0 = jnp.concatenate(
            [xp0.astype(compute_dtype), x0.astype(compute_dtype),
             xn0.astype(compute_dtype)], axis=0)             # (3*c_in0, m)
        acc = jnp.dot(w0_ref[...].astype(compute_dtype), cat0,
                      preferred_element_type=jnp.float32)
    act = jnp.maximum(acc + b0, 0.0)                         # (c, m) f32

    # ---- layers 1..n_rest: one (C, 3C) x (3C, BN*L) MXU matmul per layer ----
    for layer in range(n_rest):                              # static unroll
        xp, xn = _shift_with_halo(act, not_first, not_last)
        cat = jnp.concatenate(
            [xp.astype(compute_dtype), act.astype(compute_dtype),
             xn.astype(compute_dtype)], axis=0)              # (3C, m)
        acc = jnp.dot(w_ref[layer].astype(compute_dtype), cat,
                      preferred_element_type=jnp.float32)
        act = jnp.maximum(acc + b_ref[layer], 0.0)

    o_ref[...] = act.astype(o_ref.dtype)


def _fused_forward(x2, w0, b0, w_rest, b_rest, *, batch_block, length, n_rest,
                   compute_dtype):
    """One pallas_call running every layer for every sample.

    x2: (C_in0, N_pad * L) with samples contiguous along the lane axis.
    """
    c_in0, m_total = x2.shape
    c_pad = w0.shape[0]
    m_block = batch_block * length
    n_blocks = m_total // m_block

    kernel = functools.partial(_fused_denoise_kernel, length=length,
                               n_rest=n_rest, compute_dtype=compute_dtype)

    # Double-buffered in/out activation blocks + resident weights (+headroom),
    # capped at 48 MiB so it also fits v7x's 64 MiB VMEM.
    w_bytes = 4 * (w0.size + b0.size + w_rest.size + b_rest.size)
    block_bytes = 2 * (c_in0 + c_pad) * m_block * 4
    vmem_limit = int(min(48 << 20, max(3 * (block_bytes + w_bytes), 16 << 20)))

    flops = 2 * m_total * (c_pad * KSIZE * c_in0 + n_rest * c_pad * KSIZE * c_pad)
    bytes_accessed = 4 * (c_in0 * m_total + c_pad * m_total) + w_bytes

    return pl.pallas_call(
        kernel,
        out_shape=jax.ShapeDtypeStruct((c_pad, m_total), x2.dtype),
        grid_spec=pltpu.PrefetchScalarGridSpec(
            num_scalar_prefetch=0,
            grid=(n_blocks,),
            in_specs=[
                pl.BlockSpec((c_in0, m_block), lambda i: (0, i)),
                # constant block index -> weights/bias fetched once, stay resident
                pl.BlockSpec((c_pad, KSIZE * c_in0), lambda i: (0, 0)),
                pl.BlockSpec((c_pad, 1), lambda i: (0, 0)),
                pl.BlockSpec(w_rest.shape, lambda i: (0, 0, 0)),
                pl.BlockSpec(b_rest.shape, lambda i: (0, 0, 0)),
            ],
            out_specs=pl.BlockSpec((c_pad, m_block), lambda i: (0, i)),
        ),
        compiler_params=pltpu.CompilerParams(
            dimension_semantics=("parallel",),   # megacore split across v7x TCs
            vmem_limit_bytes=vmem_limit,
        ),
        cost_estimate=pl.CostEstimate(flops=flops, transcendentals=0,
                                      bytes_accessed=bytes_accessed),
    )(x2, w0, b0, w_rest, b_rest)


def init_denosing_unit_params(key, layers, in_channel=1, out_channel=16):
    """Deterministic init mirroring the PyTorch module's per-layer shapes."""
    params = []
    c_in = in_channel
    for _ in range(layers):
        key, kw, kb = jax.random.split(key, 3)
        bound = float(c_in * KSIZE) ** -0.5
        w = jax.random.uniform(kw, (out_channel, c_in, KSIZE),
                               jnp.float32, -bound, bound)
        b = jax.random.uniform(kb, (out_channel,), jnp.float32, -bound, bound)
        params.append((w, b))
        c_in = out_channel
    return params


def pack_denosing_params(params, *, sublane_multiple=16):
    """Pack per-layer (w, b) into kernel-friendly, tap-major im2col tensors.

    Returns (w0, b0, w_rest, b_rest):
      w0     : (C, KSIZE*c_in0)       layer-0 weights (input channels NOT padded)
      b0     : (C, 1)
      w_rest : (layers-1, C, 3*C)     remaining layers, channels zero-padded to C
      b_rest : (layers-1, C, 1)
    C = max out_channel rounded up to `sublane_multiple`, so (C,3C)x(3C,M) tiles are
    sublane-aligned for both f32 and bf16.  Columns are tap-major: col = k*C + c_in,
    matching the in-kernel [x_prev; x; x_next] sublane stack.  Padded channels carry
    zero weights/bias, so activations in those rows stay exactly zero.
    """
    w0, b0 = params[0]
    c_out0, c_in0, k0 = w0.shape
    assert k0 == KSIZE
    c_max = max(w.shape[0] for (w, _) in params)
    c_pad = -(-c_max // sublane_multiple) * sublane_multiple

    w0p = jnp.pad(w0, ((0, c_pad - c_out0), (0, 0), (0, 0)))
    w0p = jnp.transpose(w0p, (0, 2, 1)).reshape(c_pad, KSIZE * c_in0)
    b0p = jnp.pad(b0, ((0, c_pad - c_out0),)).reshape(c_pad, 1)

    ws, bs = [], []
    for (w, b) in params[1:]:
        c_out, c_in, k = w.shape
        assert k == KSIZE
        w = jnp.pad(w, ((0, c_pad - c_out), (0, c_pad - c_in), (0, 0)))
        b = jnp.pad(b, ((0, c_pad - c_out),))
        ws.append(jnp.transpose(w, (0, 2, 1)).reshape(c_pad, KSIZE * c_pad))
        bs.append(b.reshape(c_pad, 1))
    if ws:
        w_rest, b_rest = jnp.stack(ws), jnp.stack(bs)
    else:
        # layers == 1: dummy buffers (never read); pass n_rest=0 to the forward fn.
        w_rest = jnp.zeros((1, c_pad, KSIZE * c_pad), jnp.float32)
        b_rest = jnp.zeros((1, c_pad, 1), jnp.float32)
    return w0p, b0p, w_rest, b_rest


@functools.partial(jax.jit, static_argnames=("out_channel", "n_rest", "batch_block",
                                              "compute_dtype"))
def denosing_unit_forward(x, w0, b0, w_rest, b_rest, *, out_channel, n_rest=None,
                          batch_block=None, compute_dtype=jnp.bfloat16):
    """Sequential application of all blocks, fused into a single Pallas kernel.

    x: (N, in_channel, L) -> (N, out_channel, L).  L must be a multiple of 128.
    compute_dtype controls the matmul-operand dtype (bf16 default = MXU-native);
    accumulation and the bias+ReLU epilogue are always float32.
    """
    n, c_in, length = x.shape
    c_pad = w0.shape[0]
    assert length % 128 == 0, "signal length must be a multiple of 128 (lane width)"
    if n_rest is None:
        n_rest = int(w_rest.shape[0])

    # Auto-size the batch block: multi-MiB steps, but keep >= 2 grid steps so both
    # v7x TensorCores get work (parallel-vs-arbitrary is a no-op on v5e/v6e anyway).
    if batch_block is None:
        per_sample_bytes = (c_pad + c_in) * length * 4
        batch_block = (4 << 20) // max(per_sample_bytes, 1)
        if n >= 2:
            batch_block = min(batch_block, n // 2)
        batch_block = max(1, int(batch_block))
    batch_block = int(batch_block)

    # Pad N so arbitrary batch sizes work (padded samples are sliced away below).
    n_pad = -(-n // batch_block) * batch_block
    if n_pad != n:
        x = jnp.pad(x, ((0, n_pad - n), (0, 0), (0, 0)))

    # Layout for the kernel: (N, C_in, L) -> (C_in, N*L), samples contiguous in lanes.
    x2 = jnp.transpose(x, (1, 0, 2)).reshape(c_in, n_pad * length)

    y2 = _fused_forward(x2, w0, b0, w_rest, b_rest, batch_block=batch_block,
                        length=length, n_rest=n_rest, compute_dtype=compute_dtype)

    y = y2.reshape(c_pad, n_pad, length).transpose(1, 0, 2)
    return y[:n, :out_channel, :]


def _reference_forward(x, params):
    """Pure-JAX reference: Conv1d(k=3, pad=1, cross-correlation) + ReLU per layer."""
    out = x
    for (w, b) in params:
        n, _, length = out.shape
        xp = jnp.pad(out, ((0, 0), (0, 0), (1, 1)))
        acc = jnp.zeros((n, w.shape[0], length), jnp.float32)
        for k in range(KSIZE):
            acc = acc + jnp.einsum("oc,ncl->nol", w[:, :, k], xp[:, :, k:k + length],
                                   precision=jax.lax.Precision.HIGHEST)
        out = jnp.maximum(acc + b[None, :, None], 0.0)
    return out


if __name__ == "__main__":
    key = jax.random.PRNGKey(0)
    k_x, k_p = jax.random.split(key)

    # small shapes: batch=2, in_channel=1, out_channel=16, length=128, layers=3
    N, C_IN, C_OUT, L, LAYERS = 2, 1, 16, 128, 3

    x = jax.random.normal(k_x, (N, C_IN, L), jnp.float32)
    params = init_denosing_unit_params(k_p, LAYERS, in_channel=C_IN,
                                       out_channel=C_OUT)
    w0, b0, w_rest, b_rest = pack_denosing_params(params)
    y_ref = _reference_forward(x, params)

    # f32-operand path: exact-math check against the pure-JAX reference.
    y32 = denosing_unit_forward(x, w0, b0, w_rest, b_rest, out_channel=C_OUT,
                                compute_dtype=jnp.float32)
    y32 = jax.block_until_ready(y32)
    assert y32.shape == (N, C_OUT, L), y32.shape
    assert bool(jnp.all(jnp.isfinite(y32))), "non-finite output"
    assert bool(jnp.all(y32 >= 0.0)), "ReLU output should be non-negative"
    err32 = float(jnp.max(jnp.abs(y32 - y_ref)))
    assert err32 < 1e-4, f"f32 path mismatch vs reference: max abs err {err32}"

    # default bf16-operand path (MXU-native on v5e/v6e/v7x): looser tolerance.
    ybf = denosing_unit_forward(x, w0, b0, w_rest, b_rest, out_channel=C_OUT)
    ybf = jax.block_until_ready(ybf)
    assert ybf.shape == (N, C_OUT, L), ybf.shape
    assert bool(jnp.all(ybf >= 0.0)), "ReLU output should be non-negative"
    errbf = float(jnp.max(jnp.abs(ybf - y_ref)))
    assert errbf < 1e-1, f"bf16 path mismatch vs reference: max abs err {errbf}"

    print("KERNEL_OK")
</pallas_src>

<mosaic_0001>
module attributes {stable_mosaic.version = 11 : i64} {
  func.func @_fused_denoise_kernel(%arg0: i32, %arg1: memref<1x128xf32, #tpu.memory_space<vmem>>, %arg2: memref<16x3xf32, #tpu.memory_space<vmem>>, %arg3: memref<16x1xf32, #tpu.memory_space<vmem>>, %arg4: memref<2x16x48xf32, #tpu.memory_space<vmem>>, %arg5: memref<2x16x1xf32, #tpu.memory_space<vmem>>, %arg6: memref<16x128xf32, #tpu.memory_space<vmem>>) attributes {dimension_semantics = [#tpu.dimension_semantics<parallel>], iteration_bounds = array<i64: 2>, scalar_prefetch = 0 : i64, scratch_operands = 0 : i64, tpu.core_type = #tpu.core_type<tc>, window_params = [{transform_indices = @transform_0, window_bounds = array<i64: 1, 128>}, {pipeline_mode = #tpu.pipeline_mode<synchronous>, transform_indices = @transform_1, window_bounds = array<i64: 16, 3>}, {pipeline_mode = #tpu.pipeline_mode<synchronous>, transform_indices = @transform_2, window_bounds = array<i64: 16, 1>}, {pipeline_mode = #tpu.pipeline_mode<synchronous>, transform_indices = @transform_3, window_bounds = array<i64: 2, 16, 48>}, {pipeline_mode = #tpu.pipeline_mode<synchronous>, transform_indices = @transform_4, window_bounds = array<i64: 2, 16, 1>}, {transform_indices = @transform_5, window_bounds = array<i64: 16, 128>}]} {
    %0 = tpu.iota {dimensions = array<i32: 1>} : vector<16x128xi32>
    %c128_i32 = arith.constant 128 : i32
    %c0_i32 = arith.constant 0 : i32
    %1 = arith.cmpi eq, %c128_i32, %c0_i32 : i32
    %c1_i32 = arith.constant 1 : i32
    %2 = arith.select %1, %c1_i32, %c128_i32 : i32
    %3 = vector.broadcast %2 : i32 to vector<16x128xi32>
    %4 = arith.remsi %0, %3 : vector<16x128xi32>
    %c0_i32_0 = arith.constant 0 : i32
    %5 = vector.broadcast %c0_i32_0 : i32 to vector<16x128xi32>
    %6 = arith.cmpi ne, %4, %5 : vector<16x128xi32>
    %c0_i32_1 = arith.constant 0 : i32
    %7 = vector.broadcast %c0_i32_1 : i32 to vector<16x128xi32>
    %8 = arith.cmpi slt, %4, %7 : vector<16x128xi32>
    %c0_i32_2 = arith.constant 0 : i32
    %9 = arith.cmpi slt, %2, %c0_i32_2 : i32
    %10 = vector.broadcast %9 : i1 to vector<16x128xi1>
    %11 = vector.broadcast %10 : vector<16x128xi1> to vector<16x128xi1>
    %12 = arith.xori %8, %11 : vector<16x128xi1>
    %13 = arith.andi %12, %6 : vector<16x128xi1>
    %14 = vector.broadcast %2 : i32 to vector<16x128xi32>
    %15 = arith.addi %4, %14 : vector<16x128xi32>
    %16 = arith.select %13, %15, %4 : vector<16x128xi1>, vector<16x128xi32>
    %c0_i32_3 = arith.constant 0 : i32
    %17 = vector.broadcast %c0_i32_3 : i32 to vector<16x128xi32>
    %18 = arith.cmpi sgt, %16, %17 : vector<16x128xi32>
    %c127_i32 = arith.constant 127 : i32
    %19 = vector.broadcast %c127_i32 : i32 to vector<16x128xi32>
    %20 = arith.cmpi slt, %16, %19 : vector<16x128xi32>
    %21 = tpu.iota {dimensions = array<i32: 1>} : vector<1x128xi32>
    %c128_i32_4 = arith.constant 128 : i32
    %c0_i32_5 = arith.constant 0 : i32
    %22 = arith.cmpi eq, %c128_i32_4, %c0_i32_5 : i32
    %c1_i32_6 = arith.constant 1 : i32
    %23 = arith.select %22, %c1_i32_6, %c128_i32_4 : i32
    %24 = vector.broadcast %23 : i32 to vector<1x128xi32>
    %25 = arith.remsi %21, %24 : vector<1x128xi32>
    %c0_i32_7 = arith.constant 0 : i32
    %26 = vector.broadcast %c0_i32_7 : i32 to vector<1x128xi32>
    %27 = arith.cmpi ne, %25, %26 : vector<1x128xi32>
    %c0_i32_8 = arith.constant 0 : i32
    %28 = vector.broadcast %c0_i32_8 : i32 to vector<1x128xi32>
    %29 = arith.cmpi slt, %25, %28 : vector<1x128xi32>
    %c0_i32_9 = arith.constant 0 : i32
    %30 = arith.cmpi slt, %23, %c0_i32_9 : i32
    %31 = vector.broadcast %30 : i1 to vector<1x128xi1>
    %32 = vector.broadcast %31 : vector<1x128xi1> to vector<1x128xi1>
    %33 = arith.xori %29, %32 : vector<1x128xi1>
    %34 = arith.andi %33, %27 : vector<1x128xi1>
    %35 = vector.broadcast %23 : i32 to vector<1x128xi32>
    %36 = arith.addi %25, %35 : vector<1x128xi32>
    %37 = arith.select %34, %36, %25 : vector<1x128xi1>, vector<1x128xi32>
    %c0_i32_10 = arith.constant 0 : i32
    %38 = vector.broadcast %c0_i32_10 : i32 to vector<1x128xi32>
    %39 = arith.cmpi sgt, %37, %38 : vector<1x128xi32>
    %c127_i32_11 = arith.constant 127 : i32
    %40 = vector.broadcast %c127_i32_11 : i32 to vector<1x128xi32>
    %41 = arith.cmpi slt, %37, %40 : vector<1x128xi32>
    %c0 = arith.constant 0 : index
    %c0_12 = arith.constant 0 : index
    %42 = vector.load %arg1[%c0, %c0_12] : memref<1x128xf32, #tpu.memory_space<vmem>>, vector<1x128xf32>
    %cst = arith.constant 0.000000e+00 : f32
    %43 = vector.broadcast %cst : f32 to vector<1x1xf32>
    %44 = vector.extract_strided_slice %42 {offsets = [0, 0], sizes = [1, 127], strides = [1, 1]} : vector<1x128xf32> to vector<1x127xf32>
    %45 = tpu.concatenate %43, %44 in 1 : vector<1x1xf32>, vector<1x127xf32> -> vector<1x128xf32>
    %46 = vector.extract_strided_slice %42 {offsets = [0, 1], sizes = [1, 127], strides = [1, 1]} : vector<1x128xf32> to vector<1x127xf32>
    %47 = tpu.concatenate %46, %43 in 1 : vector<1x127xf32>, vector<1x1xf32> -> vector<1x128xf32>
    %cst_13 = arith.constant 0.000000e+00 : f32
    %48 = vector.broadcast %cst_13 : f32 to vector<1x128xf32>
    %49 = arith.select %39, %45, %48 : vector<1x128xi1>, vector<1x128xf32>
    %cst_14 = arith.constant 0.000000e+00 : f32
    %50 = vector.broadcast %cst_14 : f32 to vector<1x128xf32>
    %51 = arith.select %41, %47, %50 : vector<1x128xi1>, vector<1x128xf32>
    %c0_15 = arith.constant 0 : index
    %c0_16 = arith.constant 0 : index
    %52 = vector.load %arg3[%c0_15, %c0_16] : memref<16x1xf32, #tpu.memory_space<vmem>>, vector<16x1xf32>
    %c0_17 = arith.constant 0 : index
    %c0_18 = arith.constant 0 : index
    %53 = vector.load %arg2[%c0_17, %c0_18] : memref<16x3xf32, #tpu.memory_space<vmem>>, vector<16x3xf32>
    %54 = vector.extract_strided_slice %53 {offsets = [0, 0], sizes = [16, 1], strides = [1, 1]} : vector<16x3xf32> to vector<16x1xf32>
    %55 = vector.broadcast %54 : vector<16x1xf32> to vector<16x128xf32>
    %56 = vector.broadcast %49 : vector<1x128xf32> to vector<16x128xf32>
    %57 = arith.mulf %55, %56 : vector<16x128xf32>
    %58 = vector.extract_strided_slice %53 {offsets = [0, 1], sizes = [16, 1], strides = [1, 1]} : vector<16x3xf32> to vector<16x1xf32>
    %59 = vector.broadcast %58 : vector<16x1xf32> to vector<16x128xf32>
    %60 = vector.broadcast %42 : vector<1x128xf32> to vector<16x128xf32>
    %61 = arith.mulf %59, %60 : vector<16x128xf32>
    %62 = arith.addf %57, %61 : vector<16x128xf32>
    %63 = vector.extract_strided_slice %53 {offsets = [0, 2], sizes = [16, 1], strides = [1, 1]} : vector<16x3xf32> to vector<16x1xf32>
    %64 = vector.broadcast %63 : vector<16x1xf32> to vector<16x128xf32>
    %65 = vector.broadcast %51 : vector<1x128xf32> to vector<16x128xf32>
    %66 = arith.mulf %64, %65 : vector<16x128xf32>
    %67 = arith.addf %62, %66 : vector<16x128xf32>
    %68 = vector.broadcast %52 : vector<16x1xf32> to vector<16x128xf32>
    %69 = arith.addf %67, %68 : vector<16x128xf32>
    %cst_19 = arith.constant 0.000000e+00 : f32
    %70 = vector.broadcast %cst_19 : f32 to vector<16x128xf32>
    %71 = arith.maximumf %69, %70 : vector<16x128xf32>
    %cst_20 = arith.constant 0.000000e+00 : f32
    %72 = vector.broadcast %cst_20 : f32 to vector<16x1xf32>
    %73 = vector.extract_strided_slice %71 {offsets = [0, 0], sizes = [16, 127], strides = [1, 1]} : vector<16x128xf32> to vector<16x127xf32>
    %74 = tpu.concatenate %72, %73 in 1 : vector<16x1xf32>, vector<16x127xf32> -> vector<16x128xf32>
    %75 = vector.extract_strided_slice %71 {offsets = [0, 1], sizes = [16, 127], strides = [1, 1]} : vector<16x128xf32> to vector<16x127xf32>
    %76 = tpu.concatenate %75, %72 in 1 : vector<16x127xf32>, vector<16x1xf32> -> vector<16x128xf32>
    %cst_21 = arith.constant 0.000000e+00 : f32
    %77 = vector.broadcast %cst_21 : f32 to vector<16x128xf32>
    %78 = arith.select %18, %74, %77 : vector<16x128xi1>, vector<16x128xf32>
    %cst_22 = arith.constant 0.000000e+00 : f32
    %79 = vector.broadcast %cst_22 : f32 to vector<16x128xf32>
    %80 = arith.select %20, %76, %79 : vector<16x128xi1>, vector<16x128xf32>
    %81 = tpu.concatenate %78, %71, %80 in 0 : vector<16x128xf32>, vector<16x128xf32>, vector<16x128xf32> -> vector<48x128xf32>
    %c0_23 = arith.constant 0 : index
    %c0_24 = arith.constant 0 : index
    %c0_25 = arith.constant 0 : index
    %82 = vector.load %arg4[%c0_23, %c0_24, %c0_25] : memref<2x16x48xf32, #tpu.memory_space<vmem>>, vector<1x16x48xf32>
    %83 = vector.shape_cast %82 : vector<1x16x48xf32> to vector<16x48xf32>
    %cst_26 = arith.constant dense<0.000000e+00> : vector<16x128xf32>
    %84 = tpu.matmul %83, %81, %cst_26 {dimension_numbers = #tpu.dot_dimension_numbers<[1], [0], [0], [1], [0, 0, 1, 1], [], []>} : vector<16x48xf32>, vector<48x128xf32>, vector<16x128xf32> -> vector<16x128xf32>
    %c0_27 = arith.constant 0 : index
    %c0_28 = arith.constant 0 : index
    %c0_29 = arith.constant 0 : index
    %85 = vector.load %arg5[%c0_27, %c0_28, %c0_29] : memref<2x16x1xf32, #tpu.memory_space<vmem>>, vector<1x16x1xf32>
    %86 = vector.shape_cast %85 : vector<1x16x1xf32> to vector<16x1xf32>
    %87 = vector.broadcast %86 : vector<16x1xf32> to vector<16x128xf32>
    %88 = arith.addf %84, %87 : vector<16x128xf32>
    %cst_30 = arith.constant 0.000000e+00 : f32
    %89 = vector.broadcast %cst_30 : f32 to vector<16x128xf32>
    %90 = arith.maximumf %88, %89 : vector<16x128xf32>
    %cst_31 = arith.constant 0.000000e+00 : f32
    %91 = vector.broadcast %cst_31 : f32 to vector<16x1xf32>
    %92 = vector.extract_strided_slice %90 {offsets = [0, 0], sizes = [16, 127], strides = [1, 1]} : vector<16x128xf32> to vector<16x127xf32>
    %93 = tpu.concatenate %91, %92 in 1 : vector<16x1xf32>, vector<16x127xf32> -> vector<16x128xf32>
    %94 = vector.extract_strided_slice %90 {offsets = [0, 1], sizes = [16, 127], strides = [1, 1]} : vector<16x128xf32> to vector<16x127xf32>
    %95 = tpu.concatenate %94, %91 in 1 : vector<16x127xf32>, vector<16x1xf32> -> vector<16x128xf32>
    %cst_32 = arith.constant 0.000000e+00 : f32
    %96 = vector.broadcast %cst_32 : f32 to vector<16x128xf32>
    %97 = arith.select %18, %93, %96 : vector<16x128xi1>, vector<16x128xf32>
    %cst_33 = arith.constant 0.000000e+00 : f32
    %98 = vector.broadcast %cst_33 : f32 to vector<16x128xf32>
    %99 = arith.select %20, %95, %98 : vector<16x128xi1>, vector<16x128xf32>
    %100 = tpu.concatenate %97, %90, %99 in 0 : vector<16x128xf32>, vector<16x128xf32>, vector<16x128xf32> -> vector<48x128xf32>
    %c1 = arith.constant 1 : index
    %c0_34 = arith.constant 0 : index
    %c0_35 = arith.constant 0 : index
    %101 = vector.load %arg4[%c1, %c0_34, %c0_35] : memref<2x16x48xf32, #tpu.memory_space<vmem>>, vector<1x16x48xf32>
    %102 = vector.shape_cast %101 : vector<1x16x48xf32> to vector<16x48xf32>
    %cst_36 = arith.constant dense<0.000000e+00> : vector<16x128xf32>
    %103 = tpu.matmul %102, %100, %cst_36 {dimension_numbers = #tpu.dot_dimension_numbers<[1], [0], [0], [1], [0, 0, 1, 1], [], []>} : vector<16x48xf32>, vector<48x128xf32>, vector<16x128xf32> -> vector<16x128xf32>
    %c1_37 = arith.constant 1 : index
    %c0_38 = arith.constant 0 : index
    %c0_39 = arith.constant 0 : index
    %104 = vector.load %arg5[%c1_37, %c0_38, %c0_39] : memref<2x16x1xf32, #tpu.memory_space<vmem>>, vector<1x16x1xf32>
    %105 = vector.shape_cast %104 : vector<1x16x1xf32> to vector<16x1xf32>
    %106 = vector.broadcast %105 : vector<16x1xf32> to vector<16x128xf32>
    %107 = arith.addf %103, %106 : vector<16x128xf32>
    %cst_40 = arith.constant 0.000000e+00 : f32
    %108 = vector.broadcast %cst_40 : f32 to vector<16x128xf32>
    %109 = arith.maximumf %107, %108 : vector<16x128xf32>
    %c0_41 = arith.constant 0 : index
    %c0_42 = arith.constant 0 : index
    %110 = vector.load %arg6[%c0_41, %c0_42] : memref<16x128xf32, #tpu.memory_space<vmem>>, vector<16x128xf32>
    tpu.vector_store %arg6[%c0_41, %c0_42], %109 {strides = array<i32>} : memref<16x128xf32, #tpu.memory_space<vmem>>, vector<16x128xf32>,
    return
  }
  func.func @transform_0(%arg0: i32) -> (i32, i32) {
    %c0_i32 = arith.constant 0 : i32
    %c0_i32_0 = arith.constant 0 : i32
    return %c0_i32, %arg0 : i32, i32
  }
  func.func @transform_1(%arg0: i32) -> (i32, i32) {
    %c0_i32 = arith.constant 0 : i32
    %c0_i32_0 = arith.constant 0 : i32
    %c0_i32_1 = arith.constant 0 : i32
    return %c0_i32, %c0_i32_0 : i32, i32
  }
  func.func @transform_2(%arg0: i32) -> (i32, i32) {
    %c0_i32 = arith.constant 0 : i32
    %c0_i32_0 = arith.constant 0 : i32
    %c0_i32_1 = arith.constant 0 : i32
    return %c0_i32, %c0_i32_0 : i32, i32
  }
  func.func @transform_3(%arg0: i32) -> (i32, i32, i32) {
    %c0_i32 = arith.constant 0 : i32
    %c0_i32_0 = arith.constant 0 : i32
    %c0_i32_1 = arith.constant 0 : i32
    %c0_i32_2 = arith.constant 0 : i32
    return %c0_i32, %c0_i32_0, %c0_i32_1 : i32, i32, i32
  }
  func.func @transform_4(%arg0: i32) -> (i32, i32, i32) {
    %c0_i32 = arith.constant 0 : i32
    %c0_i32_0 = arith.constant 0 : i32
    %c0_i32_1 = arith.constant 0 : i32
    %c0_i32_2 = arith.constant 0 : i32
    return %c0_i32, %c0_i32_0, %c0_i32_1 : i32, i32, i32
  }
  func.func @transform_5(%arg0: i32) -> (i32, i32) {
    %c0_i32 = arith.constant 0 : i32
    %c0_i32_0 = arith.constant 0 : i32
    return %c0_i32, %arg0 : i32, i32
  }
}

</mosaic_0001>

<bundles_post_ra>
// kernel: denosing_unit_forward.1
= control target key start
LH: loop header
LB: loop body
LE: loop exit
PB: predicated region body
PF: predicated region fallthrough
CT: control target
= control target key end

     0   :  { %s815_s18 = smov 0   ;;  %s817_s19 = smov 0   ;;  %s966_s0 = inlined_call_operand.vmem [shape: f32[1,256], index: 0, kind: input, shape index: {}]   ;;  %s967_s1 = inlined_call_operand.vmem [shape: f32[16,3], index: 1, kind: input, shape index: {}]   ;;  %s968_s2 = inlined_call_operand.vmem [shape: f32[16,1], index: 2, kind: input, shape index: {}]   ;;  %s969_s3 = inlined_call_operand.vmem [shape: f32[2,16,48], index: 3, kind: input, shape index: {}]   ;;  %s970_s4 = inlined_call_operand.vmem [shape: f32[2,16,1], index: 4, kind: input, shape index: {}]   ;;  %s971_s5 = inlined_call_operand.vmem [shape: f32[16,256], index: 5, kind: output, shape index: {}]  }
   0x1   :  { %s819_s20 = smov 0  }
   0x2 LB: > { %s828_s21 = sadd.s32 4294967295, %s778_s20   ;;  %s830_s22 = sadd.s32 1, %s778_s20   ;;  %s778_s20 = sphi %s819_s20, %s975_s20   ;;  %s774_s19 = sphi %s817_s19, %s974_s19   ;;  %s770_s18 = sphi %s815_s18, %s973_s18  }
   0x3   : > { %s129_s23 = ssub.s32 %s778_s20, %s830_s22  ;;  %s132_s24 = sadd.s32 1, %s774_s19 }
   0x4   : > { %p130_p0 = scmp.eq.s32.totalorder %s129_s23, 0  ;;  %p142_p1 = scmp.ne.s32.totalorder %s774_s19, %s770_s18 }
   0x5   : > { %p143_p2 = scmp.eq.s32.totalorder %s828_s21, 1  ;;  %p650_p3 = scmp.ge.s32.totalorder %s778_s20, 1 }
   0x6   : > { %s838_s25 = scalar_select %p130_p0, %s774_s19, %s132_s24  }
   0x7   : > { %p840_p4 = por %p143_p2, %p142_p1  ;;  %p185_p5 = scmp.lt.s32.totalorder %s778_s20, 3 }
   0x9   : > { %p186_p6 = pnand %p650_p3, %p185_p5 }
   0xa   : > { %p210_p7 = scmp.lt.s32.totalorder (!%p186_p6), %s828_s21, 1  ;;  %s781_s10 = smov (!%p186_p6), 1  }
   0xb   : > { %189 = sbr.rel (%p186_p6) target bundleno = 827 (0x33b), region = 40  ;;  %s784_s11 = smov (!%p186_p6), 127  }
   0xc   : > { %s207_s13 = sand.u32 (!%p186_p6), 1, %s770_s18  }
   0xd   : > { %s651_s14 = sshll.u32 (!%p186_p6), %s207_s13, 4 }
   0xe   : > { %s209_s15 = scalar_lea.vmem (!%p186_p6), [#allocation2], %s651_s14 }
  0x10   : > { %v249_v0 = vld [vmem:[%s967_s1] sm:$0xff]  ;;  %v250_v1 = vld [vmem:[%s967_s1 + $0x8] sm:$0xff]  ;;  %v780_v2 = vmov 0   ;;  %s211_s6 = scalar_select %p210_p7, %s828_s21, 1  ;;  %v782_v4 = vmov 1   ;;  %v783_v5 = vmov 2   ;;  %v213_v8 = vlaneseq }
  0x11   : > { %750 = vset.pattern.permute.xlu1 %v780_v2  ;;  %748 = vset.pattern.permute.xlu0 %v780_v2  ;;  %v248_v6 = vld [vmem:[%s968_s2 + $0x8] sm:$0xff]  ;;  %v247_v7 = vld [vmem:[%s968_s2] sm:$0xff]  ;;  %vm238_vm0 = vcmask 7168   ;;  %vm243_vm2 = vcmask 1039360   ;;  %vm346_vm4 = vcmask 392192   ;;  %v659_v61 = vld [vmem:[%s969_s3 + $0x10] sm:$0xff] }
  0x12   : > { %253 = vperm.xlu1 %750, %v249_v0   ;;  %258 = vperm.xlu0 %748, %v250_v1   ;;  %s212_s9 = scalar_lea.vmem %s966_s0, %s211_s6  ;;  %v863_v9 = vand.u32 127, %v213_v8  ;;  %v262_v11 = vshrl.u32 %v213_v8, 7  ;;  %v332_v41 = vld [vmem:[%s969_s3] sm:$0xff]  ;;  %v335_v43 = vld [vmem:[%s970_s4 + $0x8] sm:$0xff]  ;;  %v661_v63 = vld [vmem:[%s970_s4 + $0x10] sm:$0xff]  ;;  %s670_s16 = sshll.u32 (%p840_p4), %s828_s21, 3 }
  0x13   : > { %v652_v3 = vld [vmem:[%s212_s9] ss:$0 sm:$0xff]  ;;  %701 = vmatprep.mubr.msk.f32.mxu0 %vm346_vm4, %v332_v41  ;;  %v333_v53 = vld [vmem:[%s969_s3 + $0x8] sm:$0xff]  ;;  %716 = vmatprep.mubr.msk.f32.mxu1 %vm346_vm4, %v659_v61  ;;  %s561_s20 = scalar_lea.vmem (%p840_p4), %s971_s5, %s670_s16 }
  0x14   : > { %vm227_vm1 = vcmp.gt.s32.totalorder %v863_v9, 0  ;;  %v263_v14 = vsub.s32 0, %v262_v11  ;;  %vm228_vm3 = vcmp.lt.s32.totalorder %v863_v9, 127  ;;  %v334_v44 = vld [vmem:[%s970_s4] sm:$0xff] }
  0x16   : > { %235 = vrot.lane.b32.xlu1 %v652_v3, %s781_s10  ;;  %749 = vset.pattern.permute.xlu0 %v782_v4 }
  0x17   : > { %751 = vset.pattern.permute.xlu1 %v782_v4  ;;  %272 = vperm.xlu0 %749, %v250_v1  }
  0x1a   : > { %268 = vperm.xlu1 %751, %v249_v0  }
  0x1b   : > { %752 = vset.pattern.permute.xlu0 %v783_v5 }
  0x1c   : > { %285 = vperm.xlu0 %752, %v250_v1  }
  0x1e   : > { %240 = vrot.lane.b32.xlu1 %v652_v3, %s784_s11 }
  0x1f   : > { %753 = vset.pattern.permute.xlu1 %v783_v5 }
  0x20   : > { %754 = vset.pattern.permute.xlu0 %v780_v2 }
  0x21   : > { %303 = vperm.xlu0 %754, %v248_v6  }
  0x22   : > { %281 = vperm.xlu1 %753, %v249_v0   ;;  %v662_v0 = vld [vmem:[%s970_s4 + $0x18] sm:$0xff] }
  0x26   : > { %755 = vset.pattern.permute.xlu1 %v780_v2 }
  0x27   : > { %298 = vperm.xlu1 %755, %v247_v7  }
  0x8d   : > { %v254_v10 = vpop.permute.xlu1 %253  ;;  %v259_v12 = vpop.permute.xlu0 %258 }
  0x91   : > { %v236_v13 = vpop.permute.xlu1 %235 }
  0x92   : > { %v239_v15 = vsel %vm238_vm0, 0.0, %v236_v13  ;;  %v273_v17 = vpop.permute.xlu0 %272 }
  0x93   : > { %v245_v16 = vsel %vm227_vm1, %v239_v15, 0.0  ;;  %v277_v20 = vmul.f32 %v652_v3, %v273_v17 }
  0x94   : > { %v264_v19 = vrot.slane %v245_v16, %v263_v14 }
  0x95   : > { %v269_v18 = vpop.permute.xlu1 %268 }
  0x96   : > { %v266_v23 = vmul.f32 %v264_v19, %v259_v12  ;;  %v265_v24 = vmul.f32 %v264_v19, %v254_v10  ;;  %v276_v25 = vmul.f32 %v652_v3, %v269_v18  ;;  %v660_v10 = vld [vmem:[%s969_s3 + $0x18] sm:$0xff] }
  0x97   : > { %v286_v22 = vpop.permute.xlu0 %285 }
  0x98   : > { %v279_v30 = vadd.f32 %v277_v20, %v266_v23  ;;  %v278_v31 = vadd.f32 %v276_v25, %v265_v24 }
  0x99   : > { %v241_v21 = vpop.permute.xlu1 %240 }
  0x9a   : > { %v244_v26 = vsel %vm243_vm2, %v241_v21, 0.0 }
  0x9b   : > { %v246_v27 = vsel %vm228_vm3, %v244_v26, 0.0 }
  0x9c   : > { %v291_v28 = vrot.slane %v246_v27, %v263_v14  ;;  %v304_v34 = vpop.permute.xlu0 %303 }
  0x9d   : > { %v282_v29 = vpop.permute.xlu1 %281 }
  0x9e   : > { %v293_v32 = vmul.f32 %v291_v28, %v286_v22  ;;  %v292_v33 = vmul.f32 %v291_v28, %v282_v29 }
  0xa0   : > { %v295_v35 = vadd.f32 %v293_v32, %v279_v30  ;;  %v294_v36 = vadd.f32 %v292_v33, %v278_v31 }
  0xa2   : > { %v307_v37 = vadd.f32 %v304_v34, %v295_v35  ;;  %v299_v38 = vpop.permute.xlu1 %298 }
  0xa3   : > { %v306_v39 = vadd.f32 %v299_v38, %v294_v36 }
  0xa4   : > { %v309_v40 = vmax.f32 %v307_v37, 0.0 }
  0xa5   : > { %v308_v42 = vmax.f32 %v306_v39, 0.0 }
  0xa6   : > { %322 = vrot.lane.b32.xlu1 %v309_v40, %s784_s11 }
  0xa7   : > { %320 = vrot.lane.b32.xlu0 %v308_v42, %s784_s11 }
  0xaa   : > { %314 = vrot.lane.b32.xlu1 %v309_v40, %s781_s10 }
  0xab   : > { %312 = vrot.lane.b32.xlu0 %v308_v42, %s781_s10 }
  0xae   : > { %343 = vperm.xlu1 %755, %v335_v43  }
  0xaf   : > { %338 = vperm.xlu0 %754, %v334_v44  }
 0x118   : > { %v323_v45 = vpop.permute.xlu1 %322 }
 0x119   : > { %v321_v46 = vpop.permute.xlu0 %320  ;;  %v327_v47 = vsel %vm243_vm2, %v323_v45, 0.0 }
 0x11a   : > { %v326_v48 = vsel %vm243_vm2, %v321_v46, 0.0  ;;  %689 = vmatprep.subr.msk.mxu0 %vm228_vm3, %v327_v47 }
 0x11b   : > { %690 = vmatpush3.msk.msra.mxu0 %vm228_vm3, %v327_v47 }
 0x11c   : > { %691 = vmatprep.subr.msk.mxu0 %vm228_vm3, %v326_v48  ;;  %v315_v49 = vpop.permute.xlu1 %314 }
 0x11d   : > { %692 = vmatpush3.msk.msra.mxu0 %vm228_vm3, %v326_v48  ;;  %v313_v50 = vpop.permute.xlu0 %312  ;;  %v319_v51 = vsel %vm238_vm0, 0.0, %v315_v49 }
 0x11e   : > { %693 = vmatprep.subr.mxu0 %v309_v40  ;;  %v318_v52 = vsel %vm238_vm0, 0.0, %v313_v50 }
 0x11f   : > { %694 = vmatpush3.msra.mxu0 %v309_v40 }
 0x120   : > { %695 = vmatprep.subr.mxu0 %v308_v42 }
 0x121   : > { %696 = vmatpush3.msra.mxu0 %v308_v42 }
 0x122   : > { %697 = vmatprep.subr.msk.mxu0 %vm227_vm1, %v319_v51 }
 0x123   : > { %698 = vmatpush3.msk.msra.mxu0 %vm227_vm1, %v319_v51 }
 0x124   : > { %699 = vmatprep.subr.msk.mxu0 %vm227_vm1, %v318_v52 }
 0x125   : > { %700 = vmatpush3.msk.msra.mxu0 %vm227_vm1, %v318_v52 }
 0x126   : > { %702 = vmatmul.mubr.msk.f32.vlgmr.msra.gmra.mxu0 %vm346_vm4, %v333_v53 }
 0x129   : > { %v344_v54 = vpop.permute.xlu1 %343 }
 0x12a   : > { %v339_v57 = vpop.permute.xlu0 %338 }
 0x1e6   : > { %v703_v55 = vpop.f32.mrf.mxu0 }
 0x1e7   : > { %v425_v56 = vadd.f32 %v703_v55, %v344_v54 }
 0x1e8   : > { %v419_v58 = vpop.f32.mrf.mxu0 }
 0x1e9   : > { %v429_v59 = vmax.f32 %v425_v56, 0.0  ;;  %v420_v60 = vadd.f32 %v419_v58, %v339_v57 }
 0x1eb   : > { %v428_v62 = vmax.f32 %v420_v60, 0.0  ;;  %442 = vrot.lane.b32.xlu1 %v429_v59, %s784_s11 }
 0x1ed   : > { %440 = vrot.lane.b32.xlu0 %v428_v62, %s784_s11 }
 0x1ef   : > { %434 = vrot.lane.b32.xlu1 %v429_v59, %s781_s10 }
 0x1f1   : > { %432 = vrot.lane.b32.xlu0 %v428_v62, %s781_s10 }
 0x1f3   : > { %460 = vperm.xlu1 %755, %v661_v63  }
 0x1f5   : > { %465 = vperm.xlu0 %754, %v662_v0  }
 0x25d   : > { %v443_v1 = vpop.permute.xlu1 %442 }
 0x25e   : > { %v447_v2 = vsel %vm243_vm2, %v443_v1, 0.0 }
 0x25f   : > { %v441_v3 = vpop.permute.xlu0 %440  ;;  %704 = vmatprep.subr.msk.mxu1 %vm228_vm3, %v447_v2 }
 0x260   : > { %v446_v4 = vsel %vm243_vm2, %v441_v3, 0.0  ;;  %705 = vmatpush3.msk.msra.mxu1 %vm228_vm3, %v447_v2 }
 0x261   : > { %706 = vmatprep.subr.msk.mxu1 %vm228_vm3, %v446_v4  ;;  %v435_v5 = vpop.permute.xlu1 %434 }
 0x262   : > { %707 = vmatpush3.msk.msra.mxu1 %vm228_vm3, %v446_v4  ;;  %v439_v7 = vsel %vm238_vm0, 0.0, %v435_v5 }
 0x263   : > { %708 = vmatprep.subr.mxu1 %v429_v59  ;;  %v433_v6 = vpop.permute.xlu0 %432 }
 0x264   : > { %709 = vmatpush3.msra.mxu1 %v429_v59  ;;  %v438_v8 = vsel %vm238_vm0, 0.0, %v433_v6 }
 0x265   : > { %710 = vmatprep.subr.mxu1 %v428_v62 }
 0x266   : > { %711 = vmatpush3.msra.mxu1 %v428_v62 }
 0x267   : > { %712 = vmatprep.subr.msk.mxu1 %vm227_vm1, %v439_v7 }
 0x268   : > { %713 = vmatpush3.msk.msra.mxu1 %vm227_vm1, %v439_v7 }
 0x269   : > { %714 = vmatprep.subr.msk.mxu1 %vm227_vm1, %v438_v8 }
 0x26a   : > { %715 = vmatpush3.msk.msra.mxu1 %vm227_vm1, %v438_v8 }
 0x26b   : > { %717 = vmatmul.mubr.msk.f32.vlgmr.msra.gmra.mxu1 %vm346_vm4, %v660_v10 }
 0x26e   : > { %v461_v14 = vpop.permute.xlu1 %460 }
 0x270   : > { %v466_v11 = vpop.permute.xlu0 %465 }
 0x32b   : > { %v718_v12 = vpop.f32.mrf.mxu1 }
 0x32c   : > { %v546_v13 = vadd.f32 %v718_v12, %v466_v11 }
 0x32d   : > { %v540_v15 = vpop.f32.mrf.mxu1 }
 0x32e   : > { %v550_v16 = vmax.f32 %v546_v13, 0.0  ;;  %v541_v17 = vadd.f32 %v540_v15, %v461_v14  ;;  %559 = sbr.rel (!%p840_p4) target bundleno = 827 (0x33b), region = 44 }
 0x330   : > { %552 = vst [vmem:[%s209_s15 + $0x8] sm:$0xff] %v550_v16  ;;  %v549_v18 = vmax.f32 %v541_v17, 0.0 }
 0x332   : > { %551 = vst [vmem:[%s209_s15] sm:$0xff] %v549_v18 }
 0x337   : > { %v594_v19 = vld [vmem:[%s209_s15 + $0x8] sm:$0xff] }
 0x338   : > { %595 = vst [vmem:[%s561_s20 + $0x10] sm:$0xff] %v594_v19 }
 0x339   : > { %v592_v9 = vld [vmem:[%s209_s15] sm:$0xff] }
 0x33a   : > { %593 = vst [vmem:[%s561_s20] sm:$0xff] %v592_v9 }
 0x33b PF: > { %p12_p8 = scmp.ge.s32.totalorder %s830_s22, 4   ;;  %s973_s18 = smov %s774_s19 }
 0x33c   : > { %s974_s19 = smov %s838_s25  ;;  %s975_s20 = smov %s830_s22 }
 0x33d   :  { %14 = sbr.rel (!%p12_p8) target bundleno = 2 (0x2), region = 110 }

</bundles_post_ra>
